<compile_context>
chip_gen: v7x
topology: tpu7x:2x2x1
jax: 0.10.0
libtpu: 0.0.40
codegen_flags: <defaults>
</compile_context>

<pallas_src>
import math

import jax
import jax.numpy as jnp
from jax import lax
from jax.experimental import pallas as pl
from jax.experimental.pallas import tpu as pltpu


def _vmem_capacity_bytes() -> int:
    """Physical VMEM of the local TPU (64 MiB/TC on v7x, 128 MiB on v5e/v6e)."""
    try:
        return int(pltpu.get_tpu_info().vmem_capacity_bytes)
    except Exception:  # conservative fallback (v7x per-TC VMEM)
        return 64 * 1024 * 1024


def _clamp_vmem(need_bytes: int, cap_bytes: int) -> int:
    return int(min(max(need_bytes, 32 << 20), int(cap_bytes * 0.9)))


def _pick_batch_tile(batch: int, feat: int, act_budget_bytes: int, x_itemsize: int) -> int:
    """Largest batch tile that divides `batch`, keeps the activation-side VMEM
    (double-buffered x/o tiles + bf16 act ping-pong + one f32 temp) under
    `act_budget_bytes`, and prefers >= 2 (ideally an even number of) grid steps
    so the "parallel" batch axis can shard across v7x's two TensorCores."""
    # per batch-row bytes: 2x x tile + 2x o tile + 2x bf16 act + 1 f32 temp.
    per_row = feat * (4 * x_itemsize + 2 * 2 + 4)
    cap = max(8, act_budget_bytes // max(per_row, 1))
    divisors = [tb for tb in (1024, 512, 256, 128, 64, 32, 16, 8)
                if tb <= batch and batch % tb == 0 and tb <= cap]
    if not divisors:
        return batch  # tiny (< 8) or awkward batch: single full-batch tile
    for tb in divisors:                              # largest first
        nb = batch // tb
        if nb >= 2 and nb % 2 == 0:                  # even tile count: v7x megacore
            return tb
    for tb in divisors:
        if batch // tb >= 2:
            return tb
    return divisors[0]


def _pick_out_tile(feat: int, budget_bytes: int, w_itemsize: int) -> int:
    """F_out tile for the stream path: the double-buffered (tn, F) weight slab
    should take <= ~40% of the VMEM budget; keep it lane-aligned (mult. of 128)."""
    cap = max(1, int(0.4 * budget_bytes) // max(2 * feat * w_itemsize, 1))
    for tn in (2048, 1024, 512, 256, 128):
        if feat % tn == 0 and tn <= cap:
            return tn
    if feat % 128 == 0:
        # TODO(synk): for extreme F even a (128, F) slab is large; a further
        # F_in (K-axis) grid with an accumulator would be needed.
        return 128
    return feat  # small / non-128-aligned F: take the full row dimension


def _make_fused_kernel(num_layers: int):
    """All layers in one grid step: bf16 weight stack resident in VMEM,
    activation carried in bf16, f32 accumulation via preferred_element_type."""

    def layer_step(layer, act, w_ref, b_ref):
        w = w_ref[layer]                      # (F_out, F_in) bf16
        bias = b_ref[pl.ds(layer, 1), :]      # (1, F_out) f32 — rank 2, broadcasts
        y = lax.dot_general(
            act, w,
            dimension_numbers=(((1,), (1,)), ((), ())),   # contract F_in: act @ W.T
            preferred_element_type=jnp.float32,
        ) + bias
        return y.astype(jnp.bfloat16)

    def kernel(x_ref, w_ref, b_ref, o_ref):
        act = x_ref[...].astype(jnp.bfloat16)
        if num_layers <= 8:
            for layer in range(num_layers):   # small L: static unroll
                act = layer_step(layer, act, w_ref, b_ref)
        else:                                 # large L: bounded code size / vreg pressure
            act = lax.fori_loop(
                0, num_layers,
                lambda l, a: layer_step(l, a, w_ref, b_ref),
                act, unroll=2)
        o_ref[...] = act.astype(o_ref.dtype)

    return kernel


def _stream_block_kernel(x_ref, w_ref, b_ref, o_ref, act_ref):
    """One (layer, F_out-tile) pair per inner grid step.

    grid = (batch "parallel", layers "arbitrary", out-tiles "arbitrary")
    x_ref  : (tb, F)     input batch tile (fetched once per batch tile)
    w_ref  : (1, tn, F)  bf16 weight slab for this (layer, out-tile)
    b_ref  : (1, tn)     f32 bias slice
    o_ref  : (tb, F)     output tile, resident across the inner axes
    act_ref: (2, tb, F)  bf16 activation ping-pong, indexed by layer parity

    NOTE(v7x): with the batch axis "parallel", both TensorCores independently
    stream the full weight stack from HBM (2x weight traffic); the wrapper
    prefers the fused path whenever it fits, and keeps tb large so the stream
    path stays MXU-bound (flop/byte ~ tb with bf16 weights).
    """
    layer = pl.program_id(1)
    j = pl.program_id(2)
    num_layers = pl.num_programs(1)
    tn = w_ref.shape[1]
    col = pl.multiple_of(j * tn, tn)

    @pl.when((layer == 0) & (j == 0))
    def _():
        act_ref[0] = x_ref[...].astype(jnp.bfloat16)

    src = layer % 2
    y = lax.dot_general(
        act_ref[src], w_ref[0],
        dimension_numbers=(((1,), (1,)), ((), ())),   # contract F_in: act @ W.T
        preferred_element_type=jnp.float32,
    ) + b_ref[...]                                    # (1, tn) broadcasts over rows

    not_last = layer < num_layers - 1

    @pl.when(not_last & (src == 0))
    def _():
        act_ref[1, :, pl.ds(col, tn)] = y.astype(jnp.bfloat16)

    @pl.when(not_last & (src == 1))
    def _():
        act_ref[0, :, pl.ds(col, tn)] = y.astype(jnp.bfloat16)

    @pl.when(layer == num_layers - 1)
    def _():
        o_ref[:, pl.ds(col, tn)] = y.astype(o_ref.dtype)


def block_forward(x, weights, biases, *, force_stream=False):
    """Forward pass of Block: x -> Linear(F, F) repeated L times.

    x:       (B, F)
    weights: (L, F, F)  PyTorch layout (F_out, F_in) — contracted as-is (x @ W.T)
    biases:  (L, F)

    Weights are cast to bfloat16 once here (halves weight DMA / VMEM, full-rate
    MXU); accumulation stays f32, bias is added in f32.
    """
    B, F = x.shape
    L, F_out, F_in = weights.shape
    assert F_out == F and F_in == F, "Block uses square Linear(features, features)"
    assert biases.shape == (L, F)

    w_bf16 = weights.astype(jnp.bfloat16)   # one-time cast, PyTorch layout kept
    b_f32 = biases.astype(jnp.float32)      # bias stays f32 (tiny, exact add)

    x_item = jnp.dtype(x.dtype).itemsize
    vmem_cap = _vmem_capacity_bytes()
    budget = int(vmem_cap * 0.6)

    tb = _pick_batch_tile(B, F, act_budget_bytes=int(vmem_cap * 0.3), x_itemsize=x_item)
    nb = B // tb

    x_bytes = tb * F * x_item
    o_bytes = tb * F * x_item
    w_bytes = L * F * F * 2        # bf16 weight stack
    b_bytes = L * F * 4            # f32 bias stack
    f32_row = tb * F * 4           # one (tb, F) f32 temporary

    # Fused path VMEM: resident weights/bias single-buffered (constant block
    # index), x/o double-buffered, ~3 live (tb, F) matmul/cast temporaries.
    fused_need = w_bytes + b_bytes + 2 * (x_bytes + o_bytes) + 3 * f32_row
    use_fused = (not force_stream) and (fused_need <= budget)

    flops = 2 * B * F * F * L

    def _call(in_specs, out_spec, scratch, kernel, grid, dims, vmem_limit, bytes_accessed):
        return pl.pallas_call(
            kernel,
            out_shape=jax.ShapeDtypeStruct((B, F), x.dtype),
            grid_spec=pltpu.PrefetchScalarGridSpec(
                num_scalar_prefetch=0,
                grid=grid,
                in_specs=in_specs,
                out_specs=out_spec,
                scratch_shapes=scratch,
            ),
            compiler_params=pltpu.CompilerParams(
                dimension_semantics=dims,
                vmem_limit_bytes=vmem_limit,
            ),
            cost_estimate=pl.CostEstimate(
                flops=flops, transcendentals=0, bytes_accessed=int(bytes_accessed)),
        )(x, w_bf16, b_f32)

    if use_fused:
        grid = (nb,)
        dims = ("parallel",)
        out_spec = pl.BlockSpec((tb, F), lambda i: (i, 0))
        kernel = _make_fused_kernel(L)
        bytes_accessed = w_bytes + b_bytes + 2 * B * F * x_item
        # Limit is generous enough for either single- or double-buffered residents.
        vmem_limit = _clamp_vmem(fused_need + w_bytes + b_bytes + (8 << 20), vmem_cap)

        def _fused_in_specs(single_buffer_residents):
            kw = dict(pipeline_mode=pl.Buffered(1)) if single_buffer_residents else {}
            return [
                pl.BlockSpec((tb, F), lambda i: (i, 0)),              # x batch tile
                pl.BlockSpec((L, F, F), lambda i: (0, 0, 0), **kw),   # resident weight stack
                pl.BlockSpec((L, F), lambda i: (0, 0), **kw),         # resident bias stack
            ]

        try:
            # Resident stacks are never re-fetched (constant block index) →
            # single-buffer them to halve the dominant VMEM term (v7x: 64 MiB/TC).
            return _call(_fused_in_specs(True), out_spec, [], kernel, grid, dims,
                         vmem_limit, bytes_accessed)
        except Exception:
            # pipeline_mode=pl.Buffered(1) unsupported on this JAX/Mosaic:
            # fall back to default buffering (costs VMEM headroom only).
            return _call(_fused_in_specs(False), out_spec, [], kernel, grid, dims,
                         vmem_limit, bytes_accessed)

    # Streamed fallback: per-(layer, F_out-tile) weight slabs, act carried in VMEM.
    tn = _pick_out_tile(F, budget, w_itemsize=2)
    if F % tn != 0:
        tn = F
    nj = F // tn
    grid = (nb, L, nj)
    dims = ("parallel", "arbitrary", "arbitrary")
    in_specs = [
        pl.BlockSpec((tb, F), lambda i, l, j: (i, 0)),        # re-fetched per batch tile only
        pl.BlockSpec((1, tn, F), lambda i, l, j: (l, j, 0)),  # per-(layer, N-tile) bf16 slab
        pl.BlockSpec((1, tn), lambda i, l, j: (l, j)),        # per-(layer, N-tile) bias
    ]
    out_spec = pl.BlockSpec((tb, F), lambda i, l, j: (i, 0))  # resident across l, j
    scratch = [pltpu.VMEM((2, tb, F), jnp.bfloat16)]          # act ping-pong
    vmem_need = (2 * (tn * F * 2 + tn * 4)      # double-buffered weight / bias slabs
                 + 2 * (x_bytes + o_bytes)      # double-buffered x / o tiles
                 + 2 * tb * F * 2               # bf16 act ping-pong scratch
                 + tb * tn * 4 + f32_row)       # f32 dot output temp + slack
    vmem_limit = _clamp_vmem(vmem_need + (8 << 20), vmem_cap)
    bytes_accessed = nb * (w_bytes + b_bytes) + 2 * B * F * x_item
    return _call(in_specs, out_spec, scratch, _stream_block_kernel, grid, dims,
                 vmem_limit, bytes_accessed)


def block_forward_ref(x, weights, biases):
    """Pure-JAX f32 reference matching nn.Sequential([nn.Linear(F, F)] * L)."""
    out = x.astype(jnp.float32)
    for l in range(weights.shape[0]):
        out = out @ weights[l].T + biases[l]
    return out.astype(x.dtype)


def _make_problem(key, B, F, L):
    kx, kw, kb = jax.random.split(key, 3)
    x = jax.random.normal(kx, (B, F), dtype=jnp.float32)
    bound = 1.0 / math.sqrt(F)
    w = jax.random.uniform(kw, (L, F, F), jnp.float32, -bound, bound)
    b = jax.random.uniform(kb, (L, F), jnp.float32, -bound, bound)
    # Quantize to bf16-representable f32 so the in-kernel bf16 weight cast is
    # exact; remaining error vs. the f32 reference is only the bf16 activation
    # carry (checked with loose tolerances below).
    q = lambda a: a.astype(jnp.bfloat16).astype(jnp.float32)
    return q(x), q(w), q(b)


def _check(name, out, ref, atol=5e-2, rtol=5e-2):
    assert out.shape == ref.shape and out.dtype == ref.dtype
    assert jnp.allclose(out, ref, atol=atol, rtol=rtol), (
        f"{name} mismatch: max abs diff = {jnp.max(jnp.abs(out - ref))}")


if __name__ == "__main__":
    # Shapes consistent with Block(features=32, num_layers=3), batch=8.
    x, w, b = _make_problem(jax.random.PRNGKey(0), B=8, F=32, L=3)
    ref = block_forward_ref(x, w, b)

    out = jax.block_until_ready(block_forward(x, w, b))                    # fused path
    _check("fused", out, ref)

    out_s = jax.block_until_ready(block_forward(x, w, b, force_stream=True))
    _check("stream", out_s, ref)

    # Lane-dense shape: F multiple of 128, batch split into 2 "parallel" tiles.
    x2, w2, b2 = _make_problem(jax.random.PRNGKey(1), B=16, F=128, L=4)
    ref2 = block_forward_ref(x2, w2, b2)
    _check("fused lane-dense",
           jax.block_until_ready(block_forward(x2, w2, b2)), ref2)
    _check("stream lane-dense",
           jax.block_until_ready(block_forward(x2, w2, b2, force_stream=True)), ref2)

    print("KERNEL_OK")
</pallas_src>

<mosaic_0001>
module attributes {stable_mosaic.version = 11 : i64} {
  func.func @kernel(%arg0: i32, %arg1: memref<8x32xf32, #tpu.memory_space<vmem>>, %arg2: memref<3x32x32xbf16, #tpu.memory_space<vmem>>, %arg3: memref<3x32xf32, #tpu.memory_space<vmem>>, %arg4: memref<8x32xf32, #tpu.memory_space<vmem>>) attributes {dimension_semantics = [#tpu.dimension_semantics<parallel>], iteration_bounds = array<i64: 1>, scalar_prefetch = 0 : i64, scratch_operands = 0 : i64, tpu.core_type = #tpu.core_type<tc>, window_params = [{transform_indices = @transform_0, window_bounds = array<i64: 8, 32>}, {pipeline_mode = #tpu.pipeline_mode<synchronous>, transform_indices = @transform_1, window_bounds = array<i64: 3, 32, 32>}, {pipeline_mode = #tpu.pipeline_mode<synchronous>, transform_indices = @transform_2, window_bounds = array<i64: 3, 32>}, {transform_indices = @transform_3, window_bounds = array<i64: 8, 32>}]} {
    %c0 = arith.constant 0 : index
    %c0_0 = arith.constant 0 : index
    %0 = vector.load %arg1[%c0, %c0_0] : memref<8x32xf32, #tpu.memory_space<vmem>>, vector<8x32xf32>
    %1 = arith.truncf %0 : vector<8x32xf32> to vector<8x32xbf16>
    %c0_1 = arith.constant 0 : index
    %c0_2 = arith.constant 0 : index
    %c0_3 = arith.constant 0 : index
    %2 = vector.load %arg2[%c0_1, %c0_2, %c0_3] : memref<3x32x32xbf16, #tpu.memory_space<vmem>>, vector<1x32x32xbf16>
    %3 = vector.shape_cast %2 : vector<1x32x32xbf16> to vector<32x32xbf16>
    %c0_4 = arith.constant 0 : index
    %c0_5 = arith.constant 0 : index
    %4 = vector.load %arg3[%c0_4, %c0_5] : memref<3x32xf32, #tpu.memory_space<vmem>>, vector<1x32xf32>
    %cst = arith.constant dense<0.000000e+00> : vector<8x32xf32>
    %5 = tpu.matmul %1, %3, %cst {dimension_numbers = #tpu.dot_dimension_numbers<[1], [1], [0], [0], [0, 0, 1, 0], [], []>} : vector<8x32xbf16>, vector<32x32xbf16>, vector<8x32xf32> -> vector<8x32xf32>
    %6 = vector.broadcast %4 : vector<1x32xf32> to vector<8x32xf32>
    %7 = arith.addf %5, %6 : vector<8x32xf32>
    %8 = arith.truncf %7 : vector<8x32xf32> to vector<8x32xbf16>
    %c1 = arith.constant 1 : index
    %c0_6 = arith.constant 0 : index
    %c0_7 = arith.constant 0 : index
    %9 = vector.load %arg2[%c1, %c0_6, %c0_7] : memref<3x32x32xbf16, #tpu.memory_space<vmem>>, vector<1x32x32xbf16>
    %10 = vector.shape_cast %9 : vector<1x32x32xbf16> to vector<32x32xbf16>
    %c1_8 = arith.constant 1 : index
    %c0_9 = arith.constant 0 : index
    %11 = vector.load %arg3[%c1_8, %c0_9] : memref<3x32xf32, #tpu.memory_space<vmem>>, vector<1x32xf32>
    %cst_10 = arith.constant dense<0.000000e+00> : vector<8x32xf32>
    %12 = tpu.matmul %8, %10, %cst_10 {dimension_numbers = #tpu.dot_dimension_numbers<[1], [1], [0], [0], [0, 0, 1, 0], [], []>} : vector<8x32xbf16>, vector<32x32xbf16>, vector<8x32xf32> -> vector<8x32xf32>
    %13 = vector.broadcast %11 : vector<1x32xf32> to vector<8x32xf32>
    %14 = arith.addf %12, %13 : vector<8x32xf32>
    %15 = arith.truncf %14 : vector<8x32xf32> to vector<8x32xbf16>
    %c2 = arith.constant 2 : index
    %c0_11 = arith.constant 0 : index
    %c0_12 = arith.constant 0 : index
    %16 = vector.load %arg2[%c2, %c0_11, %c0_12] : memref<3x32x32xbf16, #tpu.memory_space<vmem>>, vector<1x32x32xbf16>
    %17 = vector.shape_cast %16 : vector<1x32x32xbf16> to vector<32x32xbf16>
    %c2_13 = arith.constant 2 : index
    %c0_14 = arith.constant 0 : index
    %18 = vector.load %arg3[%c2_13, %c0_14] : memref<3x32xf32, #tpu.memory_space<vmem>>, vector<1x32xf32>
    %cst_15 = arith.constant dense<0.000000e+00> : vector<8x32xf32>
    %19 = tpu.matmul %15, %17, %cst_15 {dimension_numbers = #tpu.dot_dimension_numbers<[1], [1], [0], [0], [0, 0, 1, 0], [], []>} : vector<8x32xbf16>, vector<32x32xbf16>, vector<8x32xf32> -> vector<8x32xf32>
    %20 = vector.broadcast %18 : vector<1x32xf32> to vector<8x32xf32>
    %21 = arith.addf %19, %20 : vector<8x32xf32>
    %22 = arith.truncf %21 : vector<8x32xf32> to vector<8x32xbf16>
    %23 = arith.extf %22 : vector<8x32xbf16> to vector<8x32xf32>
    %c0_16 = arith.constant 0 : index
    %c0_17 = arith.constant 0 : index
    %24 = vector.load %arg4[%c0_16, %c0_17] : memref<8x32xf32, #tpu.memory_space<vmem>>, vector<8x32xf32>
    tpu.vector_store %arg4[%c0_16, %c0_17], %23 {strides = array<i32>} : memref<8x32xf32, #tpu.memory_space<vmem>>, vector<8x32xf32>,
    return
  }
  func.func @transform_0(%arg0: i32) -> (i32, i32) {
    %c0_i32 = arith.constant 0 : i32
    %c0_i32_0 = arith.constant 0 : i32
    return %arg0, %c0_i32 : i32, i32
  }
  func.func @transform_1(%arg0: i32) -> (i32, i32, i32) {
    %c0_i32 = arith.constant 0 : i32
    %c0_i32_0 = arith.constant 0 : i32
    %c0_i32_1 = arith.constant 0 : i32
    %c0_i32_2 = arith.constant 0 : i32
    return %c0_i32, %c0_i32_0, %c0_i32_1 : i32, i32, i32
  }
  func.func @transform_2(%arg0: i32) -> (i32, i32) {
    %c0_i32 = arith.constant 0 : i32
    %c0_i32_0 = arith.constant 0 : i32
    %c0_i32_1 = arith.constant 0 : i32
    return %c0_i32, %c0_i32_0 : i32, i32
  }
  func.func @transform_3(%arg0: i32) -> (i32, i32) {
    %c0_i32 = arith.constant 0 : i32
    %c0_i32_0 = arith.constant 0 : i32
    return %arg0, %c0_i32 : i32, i32
  }
}

module attributes {stable_mosaic.version = 11 : i64} {
  func.func @kernel(%arg0: i32, %arg1: memref<8x32xf32, #tpu.memory_space<vmem>>, %arg2: memref<3x32x32xbf16, #tpu.memory_space<vmem>>, %arg3: memref<3x32xf32, #tpu.memory_space<vmem>>, %arg4: memref<8x32xf32, #tpu.memory_space<vmem>>) attributes {dimension_semantics = [#tpu.dimension_semantics<parallel>], iteration_bounds = array<i64: 1>, scalar_prefetch = 0 : i64, scratch_operands = 0 : i64, tpu.core_type = #tpu.core_type<tc>, window_params = [{transform_indices = @transform_0, window_bounds = array<i64: 8, 32>}, {pipeline_mode = #tpu.pipeline_mode<synchronous>, transform_indices = @transform_1, window_bounds = array<i64: 3, 32, 32>}, {pipeline_mode = #tpu.pipeline_mode<synchronous>, transform_indices = @transform_2, window_bounds = array<i64: 3, 32>}, {transform_indices = @transform_3, window_bounds = array<i64: 8, 32>}]} {
    %c0 = arith.constant 0 : index
    %c0_0 = arith.constant 0 : index
    %0 = vector.load %arg1[%c0, %c0_0] : memref<8x32xf32, #tpu.memory_space<vmem>>, vector<8x32xf32>
    %1 = arith.truncf %0 : vector<8x32xf32> to vector<8x32xbf16>
    %c0_1 = arith.constant 0 : index
    %c0_2 = arith.constant 0 : index
    %c0_3 = arith.constant 0 : index
    %2 = vector.load %arg2[%c0_1, %c0_2, %c0_3] : memref<3x32x32xbf16, #tpu.memory_space<vmem>>, vector<1x32x32xbf16>
    %3 = vector.shape_cast %2 : vector<1x32x32xbf16> to vector<32x32xbf16>
    %c0_4 = arith.constant 0 : index
    %c0_5 = arith.constant 0 : index
    %4 = vector.load %arg3[%c0_4, %c0_5] : memref<3x32xf32, #tpu.memory_space<vmem>>, vector<1x32xf32>
    %cst = arith.constant dense<0.000000e+00> : vector<8x32xf32>
    %5 = tpu.matmul %1, %3, %cst {dimension_numbers = #tpu.dot_dimension_numbers<[1], [1], [0], [0], [0, 0, 1, 0], [], []>} : vector<8x32xbf16>, vector<32x32xbf16>, vector<8x32xf32> -> vector<8x32xf32>
    %6 = vector.broadcast %4 : vector<1x32xf32> to vector<8x32xf32>
    %7 = arith.addf %5, %6 : vector<8x32xf32>
    %8 = arith.truncf %7 : vector<8x32xf32> to vector<8x32xbf16>
    %c1 = arith.constant 1 : index
    %c0_6 = arith.constant 0 : index
    %c0_7 = arith.constant 0 : index
    %9 = vector.load %arg2[%c1, %c0_6, %c0_7] : memref<3x32x32xbf16, #tpu.memory_space<vmem>>, vector<1x32x32xbf16>
    %10 = vector.shape_cast %9 : vector<1x32x32xbf16> to vector<32x32xbf16>
    %c1_8 = arith.constant 1 : index
    %c0_9 = arith.constant 0 : index
    %11 = vector.load %arg3[%c1_8, %c0_9] : memref<3x32xf32, #tpu.memory_space<vmem>>, vector<1x32xf32>
    %cst_10 = arith.constant dense<0.000000e+00> : vector<8x32xf32>
    %12 = tpu.matmul %8, %10, %cst_10 {dimension_numbers = #tpu.dot_dimension_numbers<[1], [1], [0], [0], [0, 0, 1, 0], [], []>} : vector<8x32xbf16>, vector<32x32xbf16>, vector<8x32xf32> -> vector<8x32xf32>
    %13 = vector.broadcast %11 : vector<1x32xf32> to vector<8x32xf32>
    %14 = arith.addf %12, %13 : vector<8x32xf32>
    %15 = arith.truncf %14 : vector<8x32xf32> to vector<8x32xbf16>
    %c2 = arith.constant 2 : index
    %c0_11 = arith.constant 0 : index
    %c0_12 = arith.constant 0 : index
    %16 = vector.load %arg2[%c2, %c0_11, %c0_12] : memref<3x32x32xbf16, #tpu.memory_space<vmem>>, vector<1x32x32xbf16>
    %17 = vector.shape_cast %16 : vector<1x32x32xbf16> to vector<32x32xbf16>
    %c2_13 = arith.constant 2 : index
    %c0_14 = arith.constant 0 : index
    %18 = vector.load %arg3[%c2_13, %c0_14] : memref<3x32xf32, #tpu.memory_space<vmem>>, vector<1x32xf32>
    %cst_15 = arith.constant dense<0.000000e+00> : vector<8x32xf32>
    %19 = tpu.matmul %15, %17, %cst_15 {dimension_numbers = #tpu.dot_dimension_numbers<[1], [1], [0], [0], [0, 0, 1, 0], [], []>} : vector<8x32xbf16>, vector<32x32xbf16>, vector<8x32xf32> -> vector<8x32xf32>
    %20 = vector.broadcast %18 : vector<1x32xf32> to vector<8x32xf32>
    %21 = arith.addf %19, %20 : vector<8x32xf32>
    %22 = arith.truncf %21 : vector<8x32xf32> to vector<8x32xbf16>
    %23 = arith.extf %22 : vector<8x32xbf16> to vector<8x32xf32>
    %c0_16 = arith.constant 0 : index
    %c0_17 = arith.constant 0 : index
    %24 = vector.load %arg4[%c0_16, %c0_17] : memref<8x32xf32, #tpu.memory_space<vmem>>, vector<8x32xf32>
    tpu.vector_store %arg4[%c0_16, %c0_17], %23 {strides = array<i32>} : memref<8x32xf32, #tpu.memory_space<vmem>>, vector<8x32xf32>,
    return
  }
  func.func @transform_0(%arg0: i32) -> (i32, i32) {
    %c0_i32 = arith.constant 0 : i32
    %c0_i32_0 = arith.constant 0 : i32
    return %arg0, %c0_i32 : i32, i32
  }
  func.func @transform_1(%arg0: i32) -> (i32, i32, i32) {
    %c0_i32 = arith.constant 0 : i32
    %c0_i32_0 = arith.constant 0 : i32
    %c0_i32_1 = arith.constant 0 : i32
    %c0_i32_2 = arith.constant 0 : i32
    return %c0_i32, %c0_i32_0, %c0_i32_1 : i32, i32, i32
  }
  func.func @transform_2(%arg0: i32) -> (i32, i32) {
    %c0_i32 = arith.constant 0 : i32
    %c0_i32_0 = arith.constant 0 : i32
    %c0_i32_1 = arith.constant 0 : i32
    return %c0_i32, %c0_i32_0 : i32, i32
  }
  func.func @transform_3(%arg0: i32) -> (i32, i32) {
    %c0_i32 = arith.constant 0 : i32
    %c0_i32_0 = arith.constant 0 : i32
    return %arg0, %c0_i32 : i32, i32
  }
}

</mosaic_0001>

<bundles_post_ra>
// kernel: tpu_custom_call.1
= control target key start
LH: loop header
LB: loop body
LE: loop exit
PB: predicated region body
PF: predicated region fallthrough
CT: control target
= control target key end

     0   :  { %8 = vsyncpa [#allocation3], 0  ;;  %s494_s0 = inlined_call_operand.hbm [shape: f32[8,32], index: 0, kind: input, shape index: {}]   ;;  %s495_s1 = inlined_call_operand.hbm [shape: bf16[3,32,32], index: 1, kind: input, shape index: {}]   ;;  %s496_s2 = inlined_call_operand.vmem [shape: f32[3,32], index: 2, kind: input, shape index: {}]   ;;  %s497_s3 = inlined_call_operand.hbm [shape: f32[8,32], index: 3, kind: output, shape index: {}]  }
   0x1   :  { %9 = vsyncpa [#allocation6], 0 }
   0x2   :  { %10 = vsyncpa [#allocation4], 0  ;;  %s402_s12 = smov [#allocation2]   ;;  %s403_s14 = smov [#allocation5]  }
   0x3   :  { %s17_s13 = sshll.u32 %s402_s12, 4  ;;  %s26_s15 = sshll.u32 %s403_s14, 4  ;;  %s18_s13 = int_to_ptr.vmem [resolvable:$true] %s17_s13  ;;  %s429_s15 = int_to_ptr.vmem [resolvable:$true] %s26_s15 }
   0x4   :  { %s330_s18 = scalar_lea.hbm %s494_s0, 128 }
   0x5   :  { %p331_p0 = scmp.ne.s32.totalorder %s494_s0, %s330_s18  ;;  %p334_p1 = scmp.lt.u32.totalorder %s330_s18, %s494_s0 }
   0x7   :  { %p336_p2 = pnand %p334_p1, %p331_p0 }
   0x9   :  { %339 = shalt.err (!%p336_p2)
}
   0xa   :  { %s340_s23 = scalar_lea.vmem %s18_s13, 128  ;;  %p345_p4 = scmp.lt.s32.totalorder %s18_s13, %s18_s13 }
   0xb   :  { %p341_p3 = scmp.ne.s32.totalorder %s18_s13, %s340_s23  ;;  %p346_p5 = scmp.lt.s32.totalorder %s340_s23, %s340_s23 }
   0xd   :  { %p347_p6 = por %p346_p5, %p345_p4 }
   0xf   :  { %p348_p7 = pnand %p347_p6, %p341_p3 }
  0x11   :  { %351 = shalt.err (!%p348_p7)
}
  0x12   :  { %20 = dma.hbm_to_vmem [thread:$0]  %s494_s0, 128, %s18_s13, [#allocation3]  }
  0x13   :  { %s352_s28 = scalar_lea.hbm %s495_s1, 768 }
  0x14   :  { %p353_p8 = scmp.ne.s32.totalorder %s495_s1, %s352_s28  ;;  %p356_p9 = scmp.lt.u32.totalorder %s352_s28, %s495_s1 }
  0x16   :  { %p358_p10 = pnand %p356_p9, %p353_p8 }
  0x18   :  { %361 = shalt.err (!%p358_p10)
}
  0x19   :  { %s362_s6 = scalar_lea.vmem %s429_s15, 768  ;;  %p367_p12 = scmp.lt.s32.totalorder %s429_s15, %s429_s15 }
  0x1a   :  { %p363_p11 = scmp.ne.s32.totalorder %s429_s15, %s362_s6  ;;  %p368_p13 = scmp.lt.s32.totalorder %s362_s6, %s362_s6 }
  0x1c   :  { %p369_p0 = por %p368_p13, %p367_p12 }
  0x1e   :  { %p370_p1 = pnand %p369_p0, %p363_p11 }
  0x20   :  { %373 = shalt.err (!%p370_p1)
}
  0x21   :  { %s404_s0 = smov 64   ;;  %s405_s7 = smov 4  }
  0x22   :  { %32 = dma.hbm_to_vmem [thread:$0]  %s495_s1, 768, %s429_s15, [#allocation6], %s404_s0, %s404_s0, %s405_s7  }
  0x23   :  { %396 = dma.done.wait [#allocation3], 128  }
  0x24   :  { %397 = vsyncadd [#allocation3], 4294967168 }
  0x25   :  { %398 = dma.done.wait [#allocation6], 768  }
  0x26   :  { %399 = vsyncadd [#allocation6], 4294966528  ;;  %v406_v0 = vmov 0.0   ;;  %vm407_vm0 = vmmov 0   ;;  %vm63_vm1 = vcmask 261120   ;;  %v324_v1 = vld [vmem:[#allocation5] sm:$0xff]  }
  0x27   :  { %293 = vmatprep.subr.bf16.mxu0 %v406_v0  ;;  %297 = vmatprep.mubr.msk.bf16.mxu0 %vm407_vm0, %v406_v0  ;;  %v68_v2 = vsel %vm63_vm1, %v324_v1, 0  ;;  %v326_v3 = vld [vmem:[#allocation5 + $0x10] sm:$0xff]   ;;  %v325_v4 = vld [vmem:[#allocation5 + $0x8] sm:$0xff]   ;;  %v327_v6 = vld [vmem:[#allocation5 + $0x18] sm:$0xff]   ;;  %s408_s15 = smov [#allocation7]  }
  0x28   :  { %301 = vmatprep.subr.bf16.mxu1 %v406_v0  ;;  %305 = vmatprep.mubr.msk.bf16.mxu1 %vm407_vm0, %v406_v0  ;;  %v138_v5 = vsel %vm63_vm1, %v326_v3, 0  ;;  %v71_v7 = vsel %vm63_vm1, %v325_v4, 0  ;;  %v42_v8 = vld [vmem:[#allocation2] sm:$0xff]  ;;  %v141_v9 = vsel %vm63_vm1, %v327_v6, 0  ;;  %v328_v11 = vld [vmem:[#allocation5 + $0x20] sm:$0xff]   ;;  %v329_v13 = vld [vmem:[#allocation5 + $0x28] sm:$0xff]  }
  0x29   :  { %294 = vmatpush3.bf16.xpose.msra.mxu0 %v68_v2  ;;  %302 = vmatpush3.bf16.xpose.msra.mxu1 %v138_v5  ;;  %v43_v10 = vpack.c.bf16 %v42_v8, %v42_v8  ;;  %v208_v12 = vsel %vm63_vm1, %v328_v11, 0  ;;  %v211_v14 = vsel %vm63_vm1, %v329_v13, 0  ;;  %v272_v15 = vld [vmem:[%s496_s2] ss:$0 sm:$0xff]  ;;  %v276_v22 = vld [vmem:[%s496_s2 + $0x1] ss:$0 sm:$0xff] }
  0x2a   :  { %295 = vmatprep.subr.bf16.mxu0 %v406_v0  ;;  %303 = vmatprep.subr.bf16.mxu1 %v406_v0  ;;  %v280_v29 = vld [vmem:[%s496_s2 + $0x2] ss:$0 sm:$0xff]  ;;  %s262_s16 = sshll.u32 %s408_s15, 4  ;;  %s263_s16 = int_to_ptr.vmem [resolvable:$true] %s262_s16 }
  0x2b   :  { %s374_s17 = scalar_lea.vmem %s263_s16, 128  ;;  %p379_p3 = scmp.lt.s32.totalorder %s263_s16, %s263_s16 }
  0x2c   :  { %p375_p2 = scmp.ne.s32.totalorder %s263_s16, %s374_s17  ;;  %p380_p4 = scmp.lt.s32.totalorder %s374_s17, %s374_s17 }
  0x2e   :  { %p381_p5 = por %p380_p4, %p379_p3 }
  0x30   :  { %p382_p6 = pnand %p381_p5, %p375_p2 }
  0x31   :  { %296 = vmatpush3.bf16.xpose.msra.mxu0 %v71_v7  ;;  %304 = vmatpush3.bf16.xpose.msra.mxu1 %v141_v9 }
  0x32   :  { %309 = vmatprep.subr.bf16.mxu0 %v406_v0 }
  0x38   :  { %298 = vmatmul.mubr.msk.bf16.vlgmr.msra.gmra.mrb[0].mxu0 %vm63_vm1, %v43_v10 }
  0x39   :  { %313 = vmatprep.mubr.msk.bf16.mxu0 %vm407_vm0, %v406_v0  ;;  %310 = vmatpush3.bf16.xpose.msra.mxu0 %v208_v12 }
  0x3a   :  { %311 = vmatprep.subr.bf16.mxu0 %v406_v0 }
  0x41   :  { %312 = vmatpush3.bf16.xpose.msra.mxu0 %v211_v14 }
 0x10b   :  { %v107_v16 = vpop.f32.mrb[0].mxu0 }
 0x10c   :  { %v108_v17 = vadd.f32 %v272_v15, %v107_v16  ;;  %v299_v18 = vpop.f32.mrb[1].mxu0 }
 0x10d   :  { %v110_v19 = vpop.f32.mrb[2].mxu0 }
 0x10e   :  { %v113_v20 = vpack.c.bf16 %v108_v17, %v108_v17  ;;  %v300_v21 = vpop.f32.mrb[3].mxu0 }
 0x110   :  { %306 = vmatmul.mubr.msk.bf16.vlgmr.msra.gmra.mrb[0].mxu1 %vm63_vm1, %v113_v20 }
 0x1e3   :  { %v177_v23 = vpop.f32.mrb[0].mxu1 }
 0x1e4   :  { %v178_v24 = vadd.f32 %v276_v22, %v177_v23  ;;  %v307_v25 = vpop.f32.mrb[1].mxu1 }
 0x1e5   :  { %v180_v26 = vpop.f32.mrb[2].mxu1 }
 0x1e6   :  { %v183_v27 = vpack.c.bf16 %v178_v24, %v178_v24  ;;  %v308_v28 = vpop.f32.mrb[3].mxu1 }
 0x1e8   :  { %314 = vmatmul.mubr.msk.bf16.vlgmr.msra.gmra.mrb[4].mxu0 %vm63_vm1, %v183_v27 }
 0x2bb   :  { %v247_v30 = vpop.f32.mrb[4].mxu0 }
 0x2bc   :  { %v248_v31 = vadd.f32 %v280_v29, %v247_v30  ;;  %v315_v32 = vpop.f32.mrb[5].mxu0 }
 0x2bd   :  { %v250_v33 = vpop.f32.mrb[6].mxu0 }
 0x2be   :  { %v253_v34 = vpack.c.bf16 %v248_v31, %v248_v31  ;;  %v316_v35 = vpop.f32.mrb[7].mxu0 }
 0x2c0   :  { %v254_v36 = vunpack.c.l.bf16 %v253_v34 }
 0x2c2   :  { %255 = vst.msk [vmem:[#allocation7] sm:$0xff] %vm63_vm1, %v254_v36 }
 0x2c3   :  { %385 = shalt.err (!%p382_p6)
}
 0x2c4   :  { %s386_s19 = scalar_lea.hbm %s497_s3, 128 }
 0x2c5   :  { %p387_p7 = scmp.ne.s32.totalorder %s497_s3, %s386_s19  ;;  %p390_p8 = scmp.lt.u32.totalorder %s386_s19, %s497_s3 }
 0x2c7   :  { %p392_p9 = pnand %p390_p8, %p387_p7 }
 0x2c9   :  { %395 = shalt.err (!%p392_p9)
}
 0x2ca   :  { %265 = dma.vmem_to_hbm [thread:$0]  %s263_s16, 128, %s497_s3, [#allocation4]  }
 0x2cb   :  { %400 = dma.done.wait [#allocation4], 128  }
 0x2cc   :  { %401 = vsyncadd [#allocation4], 4294967168 }
 0x2cd   :  { %269 = vsyncpa [#allocation3], 1 }
 0x2ce   :  { %270 = vsyncpa [#allocation6], 1 }
 0x2cf   :  { %271 = vsyncpa [#allocation4], 1 }

// kernel: tpu_custom_call.1
= control target key start
LH: loop header
LB: loop body
LE: loop exit
PB: predicated region body
PF: predicated region fallthrough
CT: control target
= control target key end

     0   :  { %8 = vsyncpa [#allocation3], 0  ;;  %s494_s0 = inlined_call_operand.hbm [shape: f32[8,32], index: 0, kind: input, shape index: {}]   ;;  %s495_s1 = inlined_call_operand.hbm [shape: bf16[3,32,32], index: 1, kind: input, shape index: {}]   ;;  %s496_s2 = inlined_call_operand.vmem [shape: f32[3,32], index: 2, kind: input, shape index: {}]   ;;  %s497_s3 = inlined_call_operand.hbm [shape: f32[8,32], index: 3, kind: output, shape index: {}]  }
   0x1   :  { %9 = vsyncpa [#allocation6], 0 }
   0x2   :  { %10 = vsyncpa [#allocation4], 0  ;;  %s402_s12 = smov [#allocation2]   ;;  %s403_s14 = smov [#allocation5]  }
   0x3   :  { %s17_s13 = sshll.u32 %s402_s12, 4  ;;  %s26_s15 = sshll.u32 %s403_s14, 4  ;;  %s18_s13 = int_to_ptr.vmem [resolvable:$true] %s17_s13  ;;  %s429_s15 = int_to_ptr.vmem [resolvable:$true] %s26_s15 }
   0x4   :  { %s330_s18 = scalar_lea.hbm %s494_s0, 128 }
   0x5   :  { %p331_p0 = scmp.ne.s32.totalorder %s494_s0, %s330_s18  ;;  %p334_p1 = scmp.lt.u32.totalorder %s330_s18, %s494_s0 }
   0x7   :  { %p336_p2 = pnand %p334_p1, %p331_p0 }
   0x9   :  { %339 = shalt.err (!%p336_p2)
}
   0xa   :  { %s340_s23 = scalar_lea.vmem %s18_s13, 128  ;;  %p345_p4 = scmp.lt.s32.totalorder %s18_s13, %s18_s13 }
   0xb   :  { %p341_p3 = scmp.ne.s32.totalorder %s18_s13, %s340_s23  ;;  %p346_p5 = scmp.lt.s32.totalorder %s340_s23, %s340_s23 }
   0xd   :  { %p347_p6 = por %p346_p5, %p345_p4 }
   0xf   :  { %p348_p7 = pnand %p347_p6, %p341_p3 }
  0x11   :  { %351 = shalt.err (!%p348_p7)
}
  0x12   :  { %20 = dma.hbm_to_vmem [thread:$0]  %s494_s0, 128, %s18_s13, [#allocation3]  }
  0x13   :  { %s352_s28 = scalar_lea.hbm %s495_s1, 768 }
  0x14   :  { %p353_p8 = scmp.ne.s32.totalorder %s495_s1, %s352_s28  ;;  %p356_p9 = scmp.lt.u32.totalorder %s352_s28, %s495_s1 }
  0x16   :  { %p358_p10 = pnand %p356_p9, %p353_p8 }
  0x18   :  { %361 = shalt.err (!%p358_p10)
}
  0x19   :  { %s362_s6 = scalar_lea.vmem %s429_s15, 768  ;;  %p367_p12 = scmp.lt.s32.totalorder %s429_s15, %s429_s15 }
  0x1a   :  { %p363_p11 = scmp.ne.s32.totalorder %s429_s15, %s362_s6  ;;  %p368_p13 = scmp.lt.s32.totalorder %s362_s6, %s362_s6 }
  0x1c   :  { %p369_p0 = por %p368_p13, %p367_p12 }
  0x1e   :  { %p370_p1 = pnand %p369_p0, %p363_p11 }
  0x20   :  { %373 = shalt.err (!%p370_p1)
}
  0x21   :  { %s404_s0 = smov 64   ;;  %s405_s7 = smov 4  }
  0x22   :  { %32 = dma.hbm_to_vmem [thread:$0]  %s495_s1, 768, %s429_s15, [#allocation6], %s404_s0, %s404_s0, %s405_s7  }
  0x23   :  { %396 = dma.done.wait [#allocation3], 128  }
  0x24   :  { %397 = vsyncadd [#allocation3], 4294967168 }
  0x25   :  { %398 = dma.done.wait [#allocation6], 768  }
  0x26   :  { %399 = vsyncadd [#allocation6], 4294966528  ;;  %v406_v0 = vmov 0.0   ;;  %vm407_vm0 = vmmov 0   ;;  %vm63_vm1 = vcmask 261120   ;;  %v324_v1 = vld [vmem:[#allocation5] sm:$0xff]  }
  0x27   :  { %293 = vmatprep.subr.bf16.mxu0 %v406_v0  ;;  %297 = vmatprep.mubr.msk.bf16.mxu0 %vm407_vm0, %v406_v0  ;;  %v68_v2 = vsel %vm63_vm1, %v324_v1, 0  ;;  %v326_v3 = vld [vmem:[#allocation5 + $0x10] sm:$0xff]   ;;  %v325_v4 = vld [vmem:[#allocation5 + $0x8] sm:$0xff]   ;;  %v327_v6 = vld [vmem:[#allocation5 + $0x18] sm:$0xff]   ;;  %s408_s15 = smov [#allocation7]  }
  0x28   :  { %301 = vmatprep.subr.bf16.mxu1 %v406_v0  ;;  %305 = vmatprep.mubr.msk.bf16.mxu1 %vm407_vm0, %v406_v0  ;;  %v138_v5 = vsel %vm63_vm1, %v326_v3, 0  ;;  %v71_v7 = vsel %vm63_vm1, %v325_v4, 0  ;;  %v42_v8 = vld [vmem:[#allocation2] sm:$0xff]  ;;  %v141_v9 = vsel %vm63_vm1, %v327_v6, 0  ;;  %v328_v11 = vld [vmem:[#allocation5 + $0x20] sm:$0xff]   ;;  %v329_v13 = vld [vmem:[#allocation5 + $0x28] sm:$0xff]  }
  0x29   :  { %294 = vmatpush3.bf16.xpose.msra.mxu0 %v68_v2  ;;  %302 = vmatpush3.bf16.xpose.msra.mxu1 %v138_v5  ;;  %v43_v10 = vpack.c.bf16 %v42_v8, %v42_v8  ;;  %v208_v12 = vsel %vm63_vm1, %v328_v11, 0  ;;  %v211_v14 = vsel %vm63_vm1, %v329_v13, 0  ;;  %v272_v15 = vld [vmem:[%s496_s2] ss:$0 sm:$0xff]  ;;  %v276_v22 = vld [vmem:[%s496_s2 + $0x1] ss:$0 sm:$0xff] }
  0x2a   :  { %295 = vmatprep.subr.bf16.mxu0 %v406_v0  ;;  %303 = vmatprep.subr.bf16.mxu1 %v406_v0  ;;  %v280_v29 = vld [vmem:[%s496_s2 + $0x2] ss:$0 sm:$0xff]  ;;  %s262_s16 = sshll.u32 %s408_s15, 4  ;;  %s263_s16 = int_to_ptr.vmem [resolvable:$true] %s262_s16 }
  0x2b   :  { %s374_s17 = scalar_lea.vmem %s263_s16, 128  ;;  %p379_p3 = scmp.lt.s32.totalorder %s263_s16, %s263_s16 }
  0x2c   :  { %p375_p2 = scmp.ne.s32.totalorder %s263_s16, %s374_s17  ;;  %p380_p4 = scmp.lt.s32.totalorder %s374_s17, %s374_s17 }
  0x2e   :  { %p381_p5 = por %p380_p4, %p379_p3 }
  0x30   :  { %p382_p6 = pnand %p381_p5, %p375_p2 }
  0x31   :  { %296 = vmatpush3.bf16.xpose.msra.mxu0 %v71_v7  ;;  %304 = vmatpush3.bf16.xpose.msra.mxu1 %v141_v9 }
  0x32   :  { %309 = vmatprep.subr.bf16.mxu0 %v406_v0 }
  0x38   :  { %298 = vmatmul.mubr.msk.bf16.vlgmr.msra.gmra.mrb[0].mxu0 %vm63_vm1, %v43_v10 }
  0x39   :  { %313 = vmatprep.mubr.msk.bf16.mxu0 %vm407_vm0, %v406_v0  ;;  %310 = vmatpush3.bf16.xpose.msra.mxu0 %v208_v12 }
  0x3a   :  { %311 = vmatprep.subr.bf16.mxu0 %v406_v0 }
  0x41   :  { %312 = vmatpush3.bf16.xpose.msra.mxu0 %v211_v14 }
 0x10b   :  { %v107_v16 = vpop.f32.mrb[0].mxu0 }
 0x10c   :  { %v108_v17 = vadd.f32 %v272_v15, %v107_v16  ;;  %v299_v18 = vpop.f32.mrb[1].mxu0 }
 0x10d   :  { %v110_v19 = vpop.f32.mrb[2].mxu0 }
 0x10e   :  { %v113_v20 = vpack.c.bf16 %v108_v17, %v108_v17  ;;  %v300_v21 = vpop.f32.mrb[3].mxu0 }
 0x110   :  { %306 = vmatmul.mubr.msk.bf16.vlgmr.msra.gmra.mrb[0].mxu1 %vm63_vm1, %v113_v20 }
 0x1e3   :  { %v177_v23 = vpop.f32.mrb[0].mxu1 }
 0x1e4   :  { %v178_v24 = vadd.f32 %v276_v22, %v177_v23  ;;  %v307_v25 = vpop.f32.mrb[1].mxu1 }
 0x1e5   :  { %v180_v26 = vpop.f32.mrb[2].mxu1 }
 0x1e6   :  { %v183_v27 = vpack.c.bf16 %v178_v24, %v178_v24  ;;  %v308_v28 = vpop.f32.mrb[3].mxu1 }
 0x1e8   :  { %314 = vmatmul.mubr.msk.bf16.vlgmr.msra.gmra.mrb[4].mxu0 %vm63_vm1, %v183_v27 }
 0x2bb   :  { %v247_v30 = vpop.f32.mrb[4].mxu0 }
 0x2bc   :  { %v248_v31 = vadd.f32 %v280_v29, %v247_v30  ;;  %v315_v32 = vpop.f32.mrb[5].mxu0 }
 0x2bd   :  { %v250_v33 = vpop.f32.mrb[6].mxu0 }
 0x2be   :  { %v253_v34 = vpack.c.bf16 %v248_v31, %v248_v31  ;;  %v316_v35 = vpop.f32.mrb[7].mxu0 }
 0x2c0   :  { %v254_v36 = vunpack.c.l.bf16 %v253_v34 }
 0x2c2   :  { %255 = vst.msk [vmem:[#allocation7] sm:$0xff] %vm63_vm1, %v254_v36 }
 0x2c3   :  { %385 = shalt.err (!%p382_p6)
}
 0x2c4   :  { %s386_s19 = scalar_lea.hbm %s497_s3, 128 }
 0x2c5   :  { %p387_p7 = scmp.ne.s32.totalorder %s497_s3, %s386_s19  ;;  %p390_p8 = scmp.lt.u32.totalorder %s386_s19, %s497_s3 }
 0x2c7   :  { %p392_p9 = pnand %p390_p8, %p387_p7 }
 0x2c9   :  { %395 = shalt.err (!%p392_p9)
}
 0x2ca   :  { %265 = dma.vmem_to_hbm [thread:$0]  %s263_s16, 128, %s497_s3, [#allocation4]  }
 0x2cb   :  { %400 = dma.done.wait [#allocation4], 128  }
 0x2cc   :  { %401 = vsyncadd [#allocation4], 4294967168 }
 0x2cd   :  { %269 = vsyncpa [#allocation3], 1 }
 0x2ce   :  { %270 = vsyncpa [#allocation6], 1 }
 0x2cf   :  { %271 = vsyncpa [#allocation4], 1 }

</bundles_post_ra>
